<compile_context>
chip_gen: v6e
topology: v6e:2x2x1
jax: 0.10.0
libtpu: 0.0.40
codegen_flags: <defaults>
</compile_context>

<pallas_src>
import numpy as np
import jax
import jax.numpy as jnp
from jax.experimental import pallas as pl
from jax.experimental.pallas import tpu as pltpu

_LANE = 128     # vreg lane width  (last dim)
_SUBLANE = 8    # vreg sublanes    (second-to-last dim, f32)


def _copy_kernel(x_ref, o_ref):
    # Identity copy of the current tile (VMEM -> VMEM).
    o_ref[...] = x_ref[...]


def _choose_layout(total, dtype):
    """Lane-dense (rows, cols, block_rows) factorization of `total` elements.

    Returns None if `total` is not a multiple of 128 (caller falls back to a
    single full-array block, which bypasses the (8,128) divisibility rule).
    """
    if total <= 0 or total % _LANE != 0:
        return None
    # cols: largest multiple of 128 (capped at 2048 lanes) dividing `total`,
    # so the output is lane-dense and stores are unmasked.
    cols = _LANE
    for mult in range(min(total // _LANE, 2048 // _LANE), 0, -1):
        cand = _LANE * mult
        if total % cand == 0:
            cols = cand
            break
    rows = total // cols
    # block_rows: multiple of 8, sized so one block is ~2 MiB.
    bytes_per_row = cols * np.dtype(dtype).itemsize
    target_block_bytes = 2 * 1024 * 1024
    block_rows = max(_SUBLANE,
                     (target_block_bytes // bytes_per_row) // _SUBLANE * _SUBLANE)
    block_rows = min(block_rows, rows)   # == rows (full dim) for small inputs
    return rows, cols, block_rows


def reshape_pallas(x, tensor_size):
    """Equivalent of ReShape(tensor_size)(x) from pggan.py.

    x:           array of shape (B, ...) (contiguous, row-major ordering).
    tensor_size: target size tuple; only tensor_size[1:] is used (the batch
                 dim comes from x), matching the PyTorch module.
    """
    b = x.shape[0]
    tail = tuple(int(d) for d in tensor_size[1:])
    n_in = int(np.prod(x.shape[1:])) if x.ndim > 1 else 1
    n_out = int(np.prod(tail)) if len(tail) > 0 else 1
    assert n_in == n_out, (
        f"cannot view {x.shape} as ({b}, {tail}): {n_in} != {n_out}")
    out_shape = (b,) + tail
    total = b * n_in

    # NOTE: a contiguous .view() is metadata-only; `x.reshape(out_shape)` alone
    # is the zero-cost answer.  The kernel below realizes it as an in-place,
    # lane-dense, tiled identity copy (kernel required by the harness).
    layout = _choose_layout(total, x.dtype)

    if layout is None:
        # Odd/tiny total (not a multiple of 128): single full-array block.
        flat = x.reshape(b, n_in)
        out_flat = pl.pallas_call(
            _copy_kernel,
            out_shape=jax.ShapeDtypeStruct((b, n_in), x.dtype),
            grid=(1,),
            in_specs=[pl.BlockSpec((b, n_in), lambda i: (0, 0))],
            out_specs=pl.BlockSpec((b, n_in), lambda i: (0, 0)),
            input_output_aliases={0: 0},
            compiler_params=pltpu.CompilerParams(
                dimension_semantics=("arbitrary",)),
        )(flat)
        return out_flat.reshape(out_shape)

    rows, cols, block_rows = layout
    flat = x.reshape(rows, cols)           # free: contiguous metadata reshape
    out_flat = pl.pallas_call(
        _copy_kernel,
        out_shape=jax.ShapeDtypeStruct((rows, cols), x.dtype),
        grid=(pl.cdiv(rows, block_rows),),
        in_specs=[pl.BlockSpec((block_rows, cols), lambda i: (i, 0))],
        out_specs=pl.BlockSpec((block_rows, cols), lambda i: (i, 0)),
        input_output_aliases={0: 0},       # in-place: no extra HBM output buffer
        compiler_params=pltpu.CompilerParams(
            dimension_semantics=("parallel",),   # shards across TCs on v7x
            vmem_limit_bytes=32 * 1024 * 1024),
    )(flat)
    return out_flat.reshape(out_shape)


if __name__ == "__main__":
    key = jax.random.PRNGKey(0)
    # Input: (B=2, C=4, H=16, W=16)  ->  reshape to (B=2, 16, 8, 8)
    x = jax.random.normal(key, (2, 4, 16, 16), dtype=jnp.float32)
    tensor_size = (1, 16, 8, 8)   # module's stored target size (dim 0 ignored)

    out = reshape_pallas(x, tensor_size)
    out = jax.block_until_ready(out)

    # Reference: plain jnp reshape (same semantics as torch .view on a
    # contiguous tensor).
    ref = x.reshape(x.shape[0], *tensor_size[1:])
    assert out.shape == ref.shape, (out.shape, ref.shape)
    np.testing.assert_array_equal(np.asarray(out), np.asarray(ref))

    print("KERNEL_OK")
</pallas_src>

<mosaic_0001>
module attributes {stable_mosaic.version = 11 : i64} {
  func.func @_copy_kernel(%arg0: i32, %arg1: memref<1x2048xf32, #tpu.memory_space<vmem>>, %arg2: memref<1x2048xf32, #tpu.memory_space<vmem>>) attributes {dimension_semantics = [#tpu.dimension_semantics<parallel>], iteration_bounds = array<i64: 1>, scalar_prefetch = 0 : i64, scratch_operands = 0 : i64, tpu.core_type = #tpu.core_type<tc>, window_params = [{transform_indices = @transform_0, window_bounds = array<i64: 1, 2048>}, {transform_indices = @transform_1, window_bounds = array<i64: 1, 2048>}]} {
    %c0 = arith.constant 0 : index
    %c0_0 = arith.constant 0 : index
    %0 = vector.load %arg1[%c0, %c0_0] : memref<1x2048xf32, #tpu.memory_space<vmem>>, vector<1x2048xf32>
    %c0_1 = arith.constant 0 : index
    %c0_2 = arith.constant 0 : index
    %1 = vector.load %arg2[%c0_1, %c0_2] : memref<1x2048xf32, #tpu.memory_space<vmem>>, vector<1x2048xf32>
    tpu.vector_store %arg2[%c0_1, %c0_2], %0 {strides = array<i32>} : memref<1x2048xf32, #tpu.memory_space<vmem>>, vector<1x2048xf32>,
    return
  }
  func.func @transform_0(%arg0: i32) -> (i32, i32) {
    %c0_i32 = arith.constant 0 : i32
    %c0_i32_0 = arith.constant 0 : i32
    return %arg0, %c0_i32 : i32, i32
  }
  func.func @transform_1(%arg0: i32) -> (i32, i32) {
    %c0_i32 = arith.constant 0 : i32
    %c0_i32_0 = arith.constant 0 : i32
    return %arg0, %c0_i32 : i32, i32
  }
}

</mosaic_0001>

<bundles_post_ra>
// kernel: tpu_custom_call.1
= control target key start
LH: loop header
LB: loop body
LE: loop exit
PB: predicated region body
PF: predicated region fallthrough
CT: control target
= control target key end

     0   :  { %6 = vsyncpa [#allocation3], 0  ;;  %s104_s0 = inlined_call_operand.hbm [shape: f32[1,2048], index: 0, kind: input, shape index: {}, may-alias: {0,1}]   ;;  %s105_s1 = inlined_call_operand.hbm [shape: f32[1,2048], index: 1, kind: output, shape index: {}, may-alias: {0,1}]  }
   0x1   :  { %7 = vsyncpa [#allocation4], 0  ;;  %s86_s6 = smov [#allocation2]  }
   0x2   :  { %s14_s7 = sshll.u32 %s86_s6, 4  ;;  %s15_s7 = int_to_ptr.vmem [resolvable:$true] %s14_s7 }
   0x3   :  { %s50_s8 = scalar_lea.vmem %s15_s7, 256  ;;  %p55_p1 = scmp.lt.s32.totalorder %s15_s7, %s15_s7 }
   0x4   :  { %p51_p0 = scmp.ne.s32.totalorder %s15_s7, %s50_s8  ;;  %p56_p2 = scmp.lt.s32.totalorder %s50_s8, %s50_s8 }
   0x6   :  { %p57_p3 = por %p56_p2, %p55_p1 }
   0x8   :  { %p58_p4 = pnand %p57_p3, %p51_p0 }
   0xa   :  { %61 = shalt.err (!%p58_p4)
}
   0xb   :  { %17 = dma.hbm_to_vmem [thread:$0]  %s104_s0, 256, %s15_s7, [#allocation3]  }
   0xc   :  { %82 = dma.done.wait [#allocation3], 256  }
   0xd   :  { %83 = vsyncadd [#allocation3], 4294967040  ;;  %s87_s11 = smov [#allocation5]   ;;  %v21_v0 = vld [vmem:[#allocation2] sm:$0xff]  ;;  %v22_v1 = vld [vmem:[#allocation2 + $0x8] sm:$0xff] }
   0xe   :  { %s31_s12 = sshll.u32 %s87_s11, 4  ;;  %23 = vst [vmem:[#allocation5] sm:$0xff] %v21_v0  ;;  %24 = vst [vmem:[#allocation5 + $0x8] sm:$0xff] %v22_v1  ;;  %s32_s12 = int_to_ptr.vmem [resolvable:$true] %s31_s12 }
   0xf   :  { %s62_s13 = scalar_lea.vmem %s32_s12, 256  ;;  %p67_p6 = scmp.lt.s32.totalorder %s32_s12, %s32_s12 }
  0x10   :  { %p63_p5 = scmp.ne.s32.totalorder %s32_s12, %s62_s13  ;;  %p68_p7 = scmp.lt.s32.totalorder %s62_s13, %s62_s13 }
  0x12   :  { %p69_p8 = por %p68_p7, %p67_p6 }
  0x14   :  { %p70_p9 = pnand %p69_p8, %p63_p5 }
  0x16   :  { %73 = shalt.err (!%p70_p9)
}
  0x17   :  { %34 = dma.vmem_to_hbm [thread:$0]  %s32_s12, 256, %s105_s1, [#allocation4]  }
  0x18   :  { %84 = dma.done.wait [#allocation4], 256  }
  0x19   :  { %85 = vsyncadd [#allocation4], 4294967040 }
  0x1a   :  { %38 = vsyncpa [#allocation3], 1 }
  0x1b   :  { %39 = vsyncpa [#allocation4], 1 }

</bundles_post_ra>
